<compile_context>
chip_gen: v7x
topology: tpu7x:2x2x1
jax: 0.10.0
libtpu: 0.0.40
codegen_flags: <defaults>
</compile_context>

<pallas_src>
import functools

import jax
import jax.numpy as jnp
from jax.experimental import pallas as pl
from jax.experimental.pallas import tpu as pltpu


def _round_up(x, m):
    return (x + m - 1) // m * m


def _make_rbm_kernel(*, k, tile_b, n_vis, n_hid, n_chains, use_host_rand):
    half = tile_b // n_chains

    def kernel(*refs):
        if use_host_rand:
            v_ref, w_ref, vb_ref, hb_ref, rh_ref, rv_ref, out_ref = refs
        else:
            seed_ref, v_ref, w_ref, vb_ref, hb_ref, out_ref = refs
            # Independent random stream per batch tile.
            pltpu.prng_seed(seed_ref[0] + pl.program_id(0))

        W = w_ref[...]                                   # (n_hid, n_vis) bf16, single copy
        # Hoisted bias broadcasts (no CSE of broadcast_in_dim inside the loop).
        hb_b = jnp.broadcast_to(hb_ref[...], (half, n_hid))   # f32
        vb_b = jnp.broadcast_to(vb_ref[...], (half, n_vis))   # f32

        def uniform_tile(shape):
            # Uniform [0,1) from 24 random bits: mask + int->f32 convert + mul.
            bits = pltpu.prng_random_bits(shape)
            u24 = jnp.bitwise_and(bits, 0x00FFFFFF)
            if u24.dtype != jnp.int32:
                u24 = u24.astype(jnp.int32)              # value-preserving (< 2**24)
            return u24.astype(jnp.float32) * (1.0 / (1 << 24))

        def uniforms_h(i):
            u = rh_ref[i] if use_host_rand else uniform_tile((tile_b, n_hid))
            return [u[c * half:(c + 1) * half, :] for c in range(n_chains)]

        def uniforms_v(i):
            u = rv_ref[i] if use_host_rand else uniform_tile((tile_b, n_vis))
            return [u[c * half:(c + 1) * half, :] for c in range(n_chains)]

        def v_to_h(vv, u):
            # F.linear(v, W, h_bias) = v @ W.T + h_bias, as a transposed contraction so
            # only one weight copy is resident (no separate W_T).
            pre = jax.lax.dot_general(vv, W, (((1,), (1,)), ((), ())),
                                      preferred_element_type=jnp.float32) + hb_b
            # torch: relu(sign(p - rand)) == 1.0 iff p > rand else 0.0 (ties -> 0)
            return (jax.nn.sigmoid(pre) > u).astype(jnp.bfloat16)

        def h_to_v(hh, u):
            # F.linear(h, W.t(), v_bias) = h @ W + v_bias
            pre = jnp.dot(hh, W, preferred_element_type=jnp.float32) + vb_b
            return (jax.nn.sigmoid(pre) > u).astype(jnp.bfloat16)

        v0 = v_ref[...]                                  # (tile_b, n_vis) bf16
        uh0 = uniforms_h(0)
        # n_chains independent sub-batch chains, interleaved so MXU and VPU/EUP overlap.
        hs = tuple(v_to_h(v0[c * half:(c + 1) * half, :], uh0[c])
                   for c in range(n_chains))

        def gibbs_step(i, hs):
            uv = uniforms_v(i)
            vs = [h_to_v(hs[c], uv[c]) for c in range(n_chains)]
            uh = uniforms_h(i + 1)
            return tuple(v_to_h(vs[c], uh[c]) for c in range(n_chains))

        # k-1 full Gibbs steps; the final v_to_h of the reference loop is dead.
        hs = jax.lax.fori_loop(0, k - 1, gibbs_step, hs,
                               unroll=True if (k - 1) <= 8 else False)

        uvl = uniforms_v(k - 1)
        for c in range(n_chains):
            out_ref[c * half:(c + 1) * half, :] = (
                h_to_v(hs[c], uvl[c]).astype(out_ref.dtype))

    return kernel


def _vmem_limit_bytes(tile_b, n_vis, n_hid, k, use_host_rand, on_tpu):
    mib = 1024 * 1024
    weights = 2 * n_hid * n_vis * 2                       # bf16 W, double-buffered
    io = 2 * tile_b * n_vis * (2 + 4)                     # bf16 v in + f32 v_ out, 2 bufs
    bias = 2 * 2 * (n_vis + n_hid) * 4
    rand = 2 * k * tile_b * (n_vis + n_hid) * 4 if use_host_rand else 0
    live = 8 * tile_b * max(n_vis, n_hid) * 4             # in-flight f32 intermediates
    need = weights + io + bias + rand + live + 4 * mib
    cap = 100 * mib                                       # v5e/v6e: 128 MiB physical VMEM
    if on_tpu:
        try:
            cap = int(pltpu.get_tpu_info().vmem_capacity_bytes) * 7 // 8
        except Exception:
            cap = 56 * mib                                # conservative (v7x: 64 MiB)
    return int(max(32 * mib, min(need, cap)))


@functools.partial(jax.jit, static_argnames=("k",))
def rbm_forward(v, W, v_bias, h_bias, seed, k=1):
    """Returns (v, v_) exactly like RBM.forward (v_ is a binary {0,1} sample)."""
    B, n_vis = v.shape
    n_hid = W.shape[0]

    # In-kernel hardware PRNG only lowers on the TPU/Mosaic backend; fall back to
    # host-generated uniforms elsewhere (e.g. CPU interpret) so the kernel always runs.
    use_host_rand = jax.default_backend() != "tpu"

    # Batch tile: aim for >= 2 grid steps when B allows it (2nd TensorCore on v7x),
    # capped at 256 rows; rounded to the sublane granularity.
    tile_b = min(256, _round_up(max(8, pl.cdiv(B, 2)), 8))
    nb = pl.cdiv(B, tile_b)
    b_pad = nb * tile_b
    # Interleave two independent sub-chains only when each half keeps >= 8 sublane rows.
    n_chains = 2 if (tile_b >= 16 and tile_b % 16 == 0) else 1

    v_bf = v.astype(jnp.bfloat16)                         # cast once (halves v-tile DMA)
    if b_pad != B:
        v_bf = jnp.pad(v_bf, ((0, b_pad - B), (0, 0)))
    W_bf = W.astype(jnp.bfloat16)                         # (n_hid, n_vis) single copy
    vb2 = v_bias.reshape(1, n_vis).astype(jnp.float32)
    hb2 = h_bias.reshape(1, n_hid).astype(jnp.float32)

    kernel = _make_rbm_kernel(k=k, tile_b=tile_b, n_vis=n_vis, n_hid=n_hid,
                              n_chains=n_chains, use_host_rand=use_host_rand)

    cost = pl.CostEstimate(
        flops=2 * 2 * k * b_pad * n_vis * n_hid,
        transcendentals=k * b_pad * (n_vis + n_hid),
        bytes_accessed=(b_pad * n_vis * 2                 # v in (bf16)
                        + n_hid * n_vis * 2               # W (bf16, single copy)
                        + (n_vis + n_hid) * 4             # biases
                        + b_pad * n_vis * 4               # v_ out (f32)
                        + (2 * k * b_pad * (n_vis + n_hid) * 4 if use_host_rand else 0)),
    )
    cparams = pltpu.CompilerParams(
        dimension_semantics=("parallel",),                # batch tiles are independent
        vmem_limit_bytes=_vmem_limit_bytes(tile_b, n_vis, n_hid, k,
                                           use_host_rand, not use_host_rand),
    )
    out_shape = jax.ShapeDtypeStruct((b_pad, n_vis), jnp.float32)

    if use_host_rand:
        key = jax.random.PRNGKey(seed)
        kh, kv = jax.random.split(key)
        rand_h = jax.random.uniform(kh, (k, b_pad, n_hid), dtype=jnp.float32)
        rand_v = jax.random.uniform(kv, (k, b_pad, n_vis), dtype=jnp.float32)
        v_out = pl.pallas_call(
            kernel,
            out_shape=out_shape,
            grid=(nb,),
            in_specs=[
                pl.BlockSpec((tile_b, n_vis), lambda b: (b, 0)),       # v tile (bf16)
                pl.BlockSpec((n_hid, n_vis), lambda b: (0, 0)),        # W (resident)
                pl.BlockSpec((1, n_vis), lambda b: (0, 0)),            # v_bias
                pl.BlockSpec((1, n_hid), lambda b: (0, 0)),            # h_bias
                pl.BlockSpec((k, tile_b, n_hid), lambda b: (0, b, 0)),  # uniforms (h)
                pl.BlockSpec((k, tile_b, n_vis), lambda b: (0, b, 0)),  # uniforms (v)
            ],
            out_specs=pl.BlockSpec((tile_b, n_vis), lambda b: (b, 0)),
            compiler_params=cparams,
            cost_estimate=cost,
        )(v_bf, W_bf, vb2, hb2, rand_h, rand_v)
    else:
        seed_arr = jnp.asarray(seed, dtype=jnp.int32).reshape(1)
        grid_spec = pltpu.PrefetchScalarGridSpec(
            num_scalar_prefetch=1,                         # seed -> SMEM
            grid=(nb,),
            in_specs=[
                pl.BlockSpec((tile_b, n_vis), lambda b, s: (b, 0)),    # v tile (bf16)
                pl.BlockSpec((n_hid, n_vis), lambda b, s: (0, 0)),     # W (resident)
                pl.BlockSpec((1, n_vis), lambda b, s: (0, 0)),         # v_bias
                pl.BlockSpec((1, n_hid), lambda b, s: (0, 0)),         # h_bias
            ],
            out_specs=pl.BlockSpec((tile_b, n_vis), lambda b, s: (b, 0)),
        )
        v_out = pl.pallas_call(
            kernel,
            out_shape=out_shape,
            grid_spec=grid_spec,
            compiler_params=cparams,
            cost_estimate=cost,
        )(seed_arr, v_bf, W_bf, vb2, hb2)

    if b_pad != B:
        v_out = v_out[:B]
    return v, v_out


if __name__ == "__main__":
    # Small, lane-dense shapes (n_vis and n_hid multiples of 128); B=32 exercises both the
    # 2-tile grid (megacore split) and the interleaved dual sub-batch chains.
    B, n_vis, n_hid, k = 32, 256, 128, 2

    key = jax.random.PRNGKey(0)
    k_w, k_v = jax.random.split(key, 2)

    # Matches __init__: W ~ randn(n_hid, n_vis) * 0.01, biases zero.
    W = jax.random.normal(k_w, (n_hid, n_vis), dtype=jnp.float32) * 0.01
    v_bias = jnp.zeros((n_vis,), dtype=jnp.float32)
    h_bias = jnp.zeros((n_hid,), dtype=jnp.float32)

    # Visible batch in [0, 1].
    v = jax.random.uniform(k_v, (B, n_vis), dtype=jnp.float32)

    v_in, v_sample = rbm_forward(v, W, v_bias, h_bias, seed=1234, k=k)
    jax.block_until_ready(v_sample)

    assert v_in.shape == (B, n_vis)
    assert v_sample.shape == (B, n_vis)
    # Gibbs samples are strictly binary {0, 1}.
    assert bool(jnp.all((v_sample == 0.0) | (v_sample == 1.0)))

    print("KERNEL_OK")
</pallas_src>

<mosaic_0001>
module attributes {stable_mosaic.version = 11 : i64} {
  func.func @kernel(%arg0: i32, %arg1: memref<16x256xbf16, #tpu.memory_space<vmem>>, %arg2: memref<128x256xbf16, #tpu.memory_space<vmem>>, %arg3: memref<1x256xf32, #tpu.memory_space<vmem>>, %arg4: memref<1x128xf32, #tpu.memory_space<vmem>>, %arg5: memref<2x16x128xf32, #tpu.memory_space<vmem>>, %arg6: memref<2x16x256xf32, #tpu.memory_space<vmem>>, %arg7: memref<16x256xf32, #tpu.memory_space<vmem>>) attributes {dimension_semantics = [#tpu.dimension_semantics<parallel>], iteration_bounds = array<i64: 2>, scalar_prefetch = 0 : i64, scratch_operands = 0 : i64, tpu.core_type = #tpu.core_type<tc>, window_params = [{transform_indices = @transform_0, window_bounds = array<i64: 16, 256>}, {pipeline_mode = #tpu.pipeline_mode<synchronous>, transform_indices = @transform_1, window_bounds = array<i64: 128, 256>}, {pipeline_mode = #tpu.pipeline_mode<synchronous>, transform_indices = @transform_2, window_bounds = array<i64: 1, 256>}, {pipeline_mode = #tpu.pipeline_mode<synchronous>, transform_indices = @transform_3, window_bounds = array<i64: 1, 128>}, {transform_indices = @transform_4, window_bounds = array<i64: 2, 16, 128>}, {transform_indices = @transform_5, window_bounds = array<i64: 2, 16, 256>}, {transform_indices = @transform_6, window_bounds = array<i64: 16, 256>}]} {
    %c0 = arith.constant 0 : index
    %c0_0 = arith.constant 0 : index
    %0 = vector.load %arg2[%c0, %c0_0] : memref<128x256xbf16, #tpu.memory_space<vmem>>, vector<128x256xbf16>
    %c0_1 = arith.constant 0 : index
    %c0_2 = arith.constant 0 : index
    %1 = vector.load %arg4[%c0_1, %c0_2] : memref<1x128xf32, #tpu.memory_space<vmem>>, vector<1x128xf32>
    %2 = vector.shape_cast %1 : vector<1x128xf32> to vector<1x128xf32>
    %3 = vector.broadcast %2 : vector<1x128xf32> to vector<8x128xf32>
    %c0_3 = arith.constant 0 : index
    %c0_4 = arith.constant 0 : index
    %4 = vector.load %arg3[%c0_3, %c0_4] : memref<1x256xf32, #tpu.memory_space<vmem>>, vector<1x256xf32>
    %5 = vector.shape_cast %4 : vector<1x256xf32> to vector<1x256xf32>
    %6 = vector.broadcast %5 : vector<1x256xf32> to vector<8x256xf32>
    %c0_5 = arith.constant 0 : index
    %c0_6 = arith.constant 0 : index
    %7 = vector.load %arg1[%c0_5, %c0_6] : memref<16x256xbf16, #tpu.memory_space<vmem>>, vector<16x256xbf16>
    %c0_7 = arith.constant 0 : index
    %c0_8 = arith.constant 0 : index
    %c0_9 = arith.constant 0 : index
    %8 = vector.load %arg5[%c0_7, %c0_8, %c0_9] : memref<2x16x128xf32, #tpu.memory_space<vmem>>, vector<1x16x128xf32>
    %9 = vector.shape_cast %8 : vector<1x16x128xf32> to vector<16x128xf32>
    %10 = vector.extract_strided_slice %9 {offsets = [0, 0], sizes = [8, 128], strides = [1, 1]} : vector<16x128xf32> to vector<8x128xf32>
    %11 = vector.extract_strided_slice %9 {offsets = [8, 0], sizes = [8, 128], strides = [1, 1]} : vector<16x128xf32> to vector<8x128xf32>
    %12 = vector.extract_strided_slice %7 {offsets = [0, 0], sizes = [8, 256], strides = [1, 1]} : vector<16x256xbf16> to vector<8x256xbf16>
    %cst = arith.constant dense<0.000000e+00> : vector<8x128xf32>
    %13 = tpu.matmul %12, %0, %cst {dimension_numbers = #tpu.dot_dimension_numbers<[1], [1], [0], [0], [0, 0, 1, 0], [], []>} : vector<8x256xbf16>, vector<128x256xbf16>, vector<8x128xf32> -> vector<8x128xf32>
    %14 = arith.addf %13, %3 : vector<8x128xf32>
    %15 = arith.negf %14 : vector<8x128xf32>
    %16 = math.exp %15 : vector<8x128xf32>
    %cst_10 = arith.constant 1.000000e+00 : f32
    %17 = vector.broadcast %cst_10 : f32 to vector<8x128xf32>
    %18 = arith.addf %17, %16 : vector<8x128xf32>
    %19 = arith.divf %17, %18 : vector<8x128xf32>
    %20 = arith.cmpf ogt, %19, %10 : vector<8x128xf32>
    %21 = arith.extui %20 : vector<8x128xi1> to vector<8x128xi32>
    %22 = arith.sitofp %21 : vector<8x128xi32> to vector<8x128xf32>
    %23 = arith.truncf %22 : vector<8x128xf32> to vector<8x128xbf16>
    %24 = vector.extract_strided_slice %7 {offsets = [8, 0], sizes = [8, 256], strides = [1, 1]} : vector<16x256xbf16> to vector<8x256xbf16>
    %cst_11 = arith.constant dense<0.000000e+00> : vector<8x128xf32>
    %25 = tpu.matmul %24, %0, %cst_11 {dimension_numbers = #tpu.dot_dimension_numbers<[1], [1], [0], [0], [0, 0, 1, 0], [], []>} : vector<8x256xbf16>, vector<128x256xbf16>, vector<8x128xf32> -> vector<8x128xf32>
    %26 = arith.addf %25, %3 : vector<8x128xf32>
    %27 = arith.negf %26 : vector<8x128xf32>
    %28 = math.exp %27 : vector<8x128xf32>
    %cst_12 = arith.constant 1.000000e+00 : f32
    %29 = vector.broadcast %cst_12 : f32 to vector<8x128xf32>
    %30 = arith.addf %29, %28 : vector<8x128xf32>
    %31 = arith.divf %29, %30 : vector<8x128xf32>
    %32 = arith.cmpf ogt, %31, %11 : vector<8x128xf32>
    %33 = arith.extui %32 : vector<8x128xi1> to vector<8x128xi32>
    %34 = arith.sitofp %33 : vector<8x128xi32> to vector<8x128xf32>
    %35 = arith.truncf %34 : vector<8x128xf32> to vector<8x128xbf16>
    %c0_i32 = arith.constant 0 : i32
    %36 = arith.index_cast %c0_i32 : i32 to index
    %c0_13 = arith.constant 0 : index
    %c0_14 = arith.constant 0 : index
    %37 = vector.load %arg6[%36, %c0_13, %c0_14] : memref<2x16x256xf32, #tpu.memory_space<vmem>>, vector<1x16x256xf32>
    %38 = vector.shape_cast %37 : vector<1x16x256xf32> to vector<16x256xf32>
    %39 = vector.extract_strided_slice %38 {offsets = [0, 0], sizes = [8, 256], strides = [1, 1]} : vector<16x256xf32> to vector<8x256xf32>
    %40 = vector.extract_strided_slice %38 {offsets = [8, 0], sizes = [8, 256], strides = [1, 1]} : vector<16x256xf32> to vector<8x256xf32>
    %cst_15 = arith.constant dense<0.000000e+00> : vector<8x256xf32>
    %41 = tpu.matmul %23, %0, %cst_15 {dimension_numbers = #tpu.dot_dimension_numbers<[1], [0], [0], [1], [0, 0, 1, 1], [], []>} : vector<8x128xbf16>, vector<128x256xbf16>, vector<8x256xf32> -> vector<8x256xf32>
    %42 = arith.addf %41, %6 : vector<8x256xf32>
    %43 = arith.negf %42 : vector<8x256xf32>
    %44 = math.exp %43 : vector<8x256xf32>
    %cst_16 = arith.constant 1.000000e+00 : f32
    %45 = vector.broadcast %cst_16 : f32 to vector<8x256xf32>
    %46 = arith.addf %45, %44 : vector<8x256xf32>
    %47 = arith.divf %45, %46 : vector<8x256xf32>
    %48 = arith.cmpf ogt, %47, %39 : vector<8x256xf32>
    %49 = arith.extui %48 : vector<8x256xi1> to vector<8x256xi32>
    %50 = arith.sitofp %49 : vector<8x256xi32> to vector<8x256xf32>
    %51 = arith.truncf %50 : vector<8x256xf32> to vector<8x256xbf16>
    %cst_17 = arith.constant dense<0.000000e+00> : vector<8x256xf32>
    %52 = tpu.matmul %35, %0, %cst_17 {dimension_numbers = #tpu.dot_dimension_numbers<[1], [0], [0], [1], [0, 0, 1, 1], [], []>} : vector<8x128xbf16>, vector<128x256xbf16>, vector<8x256xf32> -> vector<8x256xf32>
    %53 = arith.addf %52, %6 : vector<8x256xf32>
    %54 = arith.negf %53 : vector<8x256xf32>
    %55 = math.exp %54 : vector<8x256xf32>
    %cst_18 = arith.constant 1.000000e+00 : f32
    %56 = vector.broadcast %cst_18 : f32 to vector<8x256xf32>
    %57 = arith.addf %56, %55 : vector<8x256xf32>
    %58 = arith.divf %56, %57 : vector<8x256xf32>
    %59 = arith.cmpf ogt, %58, %40 : vector<8x256xf32>
    %60 = arith.extui %59 : vector<8x256xi1> to vector<8x256xi32>
    %61 = arith.sitofp %60 : vector<8x256xi32> to vector<8x256xf32>
    %62 = arith.truncf %61 : vector<8x256xf32> to vector<8x256xbf16>
    %c1_i32 = arith.constant 1 : i32
    %63 = arith.addi %c0_i32, %c1_i32 : i32
    %64 = arith.index_cast %63 : i32 to index
    %c0_19 = arith.constant 0 : index
    %c0_20 = arith.constant 0 : index
    %65 = vector.load %arg5[%64, %c0_19, %c0_20] : memref<2x16x128xf32, #tpu.memory_space<vmem>>, vector<1x16x128xf32>
    %66 = vector.shape_cast %65 : vector<1x16x128xf32> to vector<16x128xf32>
    %67 = vector.extract_strided_slice %66 {offsets = [0, 0], sizes = [8, 128], strides = [1, 1]} : vector<16x128xf32> to vector<8x128xf32>
    %68 = vector.extract_strided_slice %66 {offsets = [8, 0], sizes = [8, 128], strides = [1, 1]} : vector<16x128xf32> to vector<8x128xf32>
    %cst_21 = arith.constant dense<0.000000e+00> : vector<8x128xf32>
    %69 = tpu.matmul %51, %0, %cst_21 {dimension_numbers = #tpu.dot_dimension_numbers<[1], [1], [0], [0], [0, 0, 1, 0], [], []>} : vector<8x256xbf16>, vector<128x256xbf16>, vector<8x128xf32> -> vector<8x128xf32>
    %70 = arith.addf %69, %3 : vector<8x128xf32>
    %71 = arith.negf %70 : vector<8x128xf32>
    %72 = math.exp %71 : vector<8x128xf32>
    %cst_22 = arith.constant 1.000000e+00 : f32
    %73 = vector.broadcast %cst_22 : f32 to vector<8x128xf32>
    %74 = arith.addf %73, %72 : vector<8x128xf32>
    %75 = arith.divf %73, %74 : vector<8x128xf32>
    %76 = arith.cmpf ogt, %75, %67 : vector<8x128xf32>
    %77 = arith.extui %76 : vector<8x128xi1> to vector<8x128xi32>
    %78 = arith.sitofp %77 : vector<8x128xi32> to vector<8x128xf32>
    %79 = arith.truncf %78 : vector<8x128xf32> to vector<8x128xbf16>
    %cst_23 = arith.constant dense<0.000000e+00> : vector<8x128xf32>
    %80 = tpu.matmul %62, %0, %cst_23 {dimension_numbers = #tpu.dot_dimension_numbers<[1], [1], [0], [0], [0, 0, 1, 0], [], []>} : vector<8x256xbf16>, vector<128x256xbf16>, vector<8x128xf32> -> vector<8x128xf32>
    %81 = arith.addf %80, %3 : vector<8x128xf32>
    %82 = arith.negf %81 : vector<8x128xf32>
    %83 = math.exp %82 : vector<8x128xf32>
    %cst_24 = arith.constant 1.000000e+00 : f32
    %84 = vector.broadcast %cst_24 : f32 to vector<8x128xf32>
    %85 = arith.addf %84, %83 : vector<8x128xf32>
    %86 = arith.divf %84, %85 : vector<8x128xf32>
    %87 = arith.cmpf ogt, %86, %68 : vector<8x128xf32>
    %88 = arith.extui %87 : vector<8x128xi1> to vector<8x128xi32>
    %89 = arith.sitofp %88 : vector<8x128xi32> to vector<8x128xf32>
    %90 = arith.truncf %89 : vector<8x128xf32> to vector<8x128xbf16>
    %c1_i32_25 = arith.constant 1 : i32
    %c1 = arith.constant 1 : index
    %c0_26 = arith.constant 0 : index
    %c0_27 = arith.constant 0 : index
    %91 = vector.load %arg6[%c1, %c0_26, %c0_27] : memref<2x16x256xf32, #tpu.memory_space<vmem>>, vector<1x16x256xf32>
    %92 = vector.shape_cast %91 : vector<1x16x256xf32> to vector<16x256xf32>
    %93 = vector.extract_strided_slice %92 {offsets = [0, 0], sizes = [8, 256], strides = [1, 1]} : vector<16x256xf32> to vector<8x256xf32>
    %94 = vector.extract_strided_slice %92 {offsets = [8, 0], sizes = [8, 256], strides = [1, 1]} : vector<16x256xf32> to vector<8x256xf32>
    %cst_28 = arith.constant dense<0.000000e+00> : vector<8x256xf32>
    %95 = tpu.matmul %79, %0, %cst_28 {dimension_numbers = #tpu.dot_dimension_numbers<[1], [0], [0], [1], [0, 0, 1, 1], [], []>} : vector<8x128xbf16>, vector<128x256xbf16>, vector<8x256xf32> -> vector<8x256xf32>
    %96 = arith.addf %95, %6 : vector<8x256xf32>
    %97 = arith.negf %96 : vector<8x256xf32>
    %98 = math.exp %97 : vector<8x256xf32>
    %cst_29 = arith.constant 1.000000e+00 : f32
    %99 = vector.broadcast %cst_29 : f32 to vector<8x256xf32>
    %100 = arith.addf %99, %98 : vector<8x256xf32>
    %101 = arith.divf %99, %100 : vector<8x256xf32>
    %102 = arith.cmpf ogt, %101, %93 : vector<8x256xf32>
    %103 = arith.extui %102 : vector<8x256xi1> to vector<8x256xi32>
    %104 = arith.sitofp %103 : vector<8x256xi32> to vector<8x256xf32>
    %105 = arith.truncf %104 : vector<8x256xf32> to vector<8x256xbf16>
    %106 = arith.extf %105 : vector<8x256xbf16> to vector<8x256xf32>
    %c0_30 = arith.constant 0 : index
    %c0_31 = arith.constant 0 : index
    %107 = vector.load %arg7[%c0_30, %c0_31] : memref<16x256xf32, #tpu.memory_space<vmem>>, vector<8x256xf32>
    tpu.vector_store %arg7[%c0_30, %c0_31], %106 {strides = array<i32>} : memref<16x256xf32, #tpu.memory_space<vmem>>, vector<8x256xf32>,
    %cst_32 = arith.constant dense<0.000000e+00> : vector<8x256xf32>
    %108 = tpu.matmul %90, %0, %cst_32 {dimension_numbers = #tpu.dot_dimension_numbers<[1], [0], [0], [1], [0, 0, 1, 1], [], []>} : vector<8x128xbf16>, vector<128x256xbf16>, vector<8x256xf32> -> vector<8x256xf32>
    %109 = arith.addf %108, %6 : vector<8x256xf32>
    %110 = arith.negf %109 : vector<8x256xf32>
    %111 = math.exp %110 : vector<8x256xf32>
    %cst_33 = arith.constant 1.000000e+00 : f32
    %112 = vector.broadcast %cst_33 : f32 to vector<8x256xf32>
    %113 = arith.addf %112, %111 : vector<8x256xf32>
    %114 = arith.divf %112, %113 : vector<8x256xf32>
    %115 = arith.cmpf ogt, %114, %94 : vector<8x256xf32>
    %116 = arith.extui %115 : vector<8x256xi1> to vector<8x256xi32>
    %117 = arith.sitofp %116 : vector<8x256xi32> to vector<8x256xf32>
    %118 = arith.truncf %117 : vector<8x256xf32> to vector<8x256xbf16>
    %119 = arith.extf %118 : vector<8x256xbf16> to vector<8x256xf32>
    %c8 = arith.constant 8 : index
    %c0_34 = arith.constant 0 : index
    %120 = vector.load %arg7[%c8, %c0_34] : memref<16x256xf32, #tpu.memory_space<vmem>>, vector<8x256xf32>
    tpu.vector_store %arg7[%c8, %c0_34], %119 {strides = array<i32>} : memref<16x256xf32, #tpu.memory_space<vmem>>, vector<8x256xf32>,
    return
  }
  func.func @transform_0(%arg0: i32) -> (i32, i32) {
    %c0_i32 = arith.constant 0 : i32
    %c0_i32_0 = arith.constant 0 : i32
    return %arg0, %c0_i32 : i32, i32
  }
  func.func @transform_1(%arg0: i32) -> (i32, i32) {
    %c0_i32 = arith.constant 0 : i32
    %c0_i32_0 = arith.constant 0 : i32
    %c0_i32_1 = arith.constant 0 : i32
    return %c0_i32, %c0_i32_0 : i32, i32
  }
  func.func @transform_2(%arg0: i32) -> (i32, i32) {
    %c0_i32 = arith.constant 0 : i32
    %c0_i32_0 = arith.constant 0 : i32
    %c0_i32_1 = arith.constant 0 : i32
    return %c0_i32, %c0_i32_0 : i32, i32
  }
  func.func @transform_3(%arg0: i32) -> (i32, i32) {
    %c0_i32 = arith.constant 0 : i32
    %c0_i32_0 = arith.constant 0 : i32
    %c0_i32_1 = arith.constant 0 : i32
    return %c0_i32, %c0_i32_0 : i32, i32
  }
  func.func @transform_4(%arg0: i32) -> (i32, i32, i32) {
    %c0_i32 = arith.constant 0 : i32
    %c0_i32_0 = arith.constant 0 : i32
    %c0_i32_1 = arith.constant 0 : i32
    return %c0_i32, %arg0, %c0_i32_0 : i32, i32, i32
  }
  func.func @transform_5(%arg0: i32) -> (i32, i32, i32) {
    %c0_i32 = arith.constant 0 : i32
    %c0_i32_0 = arith.constant 0 : i32
    %c0_i32_1 = arith.constant 0 : i32
    return %c0_i32, %arg0, %c0_i32_0 : i32, i32, i32
  }
  func.func @transform_6(%arg0: i32) -> (i32, i32) {
    %c0_i32 = arith.constant 0 : i32
    %c0_i32_0 = arith.constant 0 : i32
    return %arg0, %c0_i32 : i32, i32
  }
}

</mosaic_0001>

<bundles_post_ra>
// kernel: rbm_forward.3
= control target key start
LH: loop header
LB: loop body
LE: loop exit
PB: predicated region body
PF: predicated region fallthrough
CT: control target
= control target key end

     0   :  { %11 = vsyncpa [#allocation5], 0  ;;  %s1805_s0 = inlined_call_operand.vmem [shape: bf16[32,256], index: 0, kind: input, shape index: {}]   ;;  %s1806_s1 = inlined_call_operand.vmem [shape: bf16[128,256], index: 1, kind: input, shape index: {}]   ;;  %s1807_s2 = inlined_call_operand.vmem [shape: f32[1,256], index: 2, kind: input, shape index: {}]   ;;  %s1808_s3 = inlined_call_operand.vmem [shape: f32[1,128], index: 3, kind: input, shape index: {}]   ;;  %s1809_s4 = inlined_call_operand.vmem [shape: f32[2,32,128], index: 4, kind: input, shape index: {}]   ;;  %s1810_s5 = inlined_call_operand.vmem [shape: f32[2,32,256], index: 5, kind: input, shape index: {}]   ;;  %s1811_s6 = inlined_call_operand.hbm [shape: f32[32,256], index: 6, kind: output, shape index: {}]  }
   0x1   :  { %13 = vsyncpa [#allocation5 + $0x1], 0  ;;  %s1412_s21 = smov 0   ;;  %s1414_s22 = smov 0  }
   0x2   :  { %s1416_s23 = smov 0   ;;  %s1418_s24 = smov 0  }
   0x3 LB: > { %s1433_s25 = sadd.s32 4294967295, %s1369_s24   ;;  %s1091_s26 = sadd.s32 4294967294, %s1369_s24   ;;  %s1369_s24 = sphi %s1418_s24, %s1818_s24   ;;  %s1365_s23 = sphi %s1416_s23, %s1817_s23   ;;  %s1361_s22 = sphi %s1414_s22, %s1816_s22   ;;  %s1357_s21 = sphi %s1412_s21, %s1815_s21  }
   0x4   : > { %s1437_s27 = sadd.s32 1, %s1369_s24   ;;  %s115_s28 = sadd.s32 1, %s1365_s23 }
   0x5   : > { %s112_s29 = ssub.s32 %s1369_s24, %s1437_s27  ;;  %p122_p0 = scmp.ne.s32.totalorder %s1365_s23, %s1361_s22 }
   0x6   : > { %p113_p1 = scmp.eq.s32.totalorder %s112_s29, 0  ;;  %p123_p2 = scmp.eq.s32.totalorder %s1369_s24, 0 }
   0x7   : > { %p178_p3 = scmp.eq.s32.totalorder %s1433_s25, 1  ;;  %p183_p4 = scmp.ne.s32.totalorder %s1361_s22, %s1357_s21 }
   0x8   : > { %s1449_s30 = scalar_select %p113_p1, %s1365_s23, %s115_s28  }
   0x9   : > { %p1451_p5 = por %p123_p2, %p122_p0  ;;  %p1455_p6 = por %p178_p3, %p122_p0 }
   0xa   : > { %p184_p7 = scmp.eq.s32.totalorder %s1091_s26, 1  ;;  %p1093_p9 = scmp.ge.s32.totalorder %s1369_s24, 2 }
   0xc   : > { %p1459_p8 = por %p184_p7, %p183_p4  ;;  %209 = sbr.rel (%p1093_p9) target bundleno = 34 (0x22), region = 28 }
  0x13   : > { %222 = sbr.rel (!%p1451_p5) target bundleno = 26 (0x1a), region = 36  ;;  %s224_s10 = sand.u32 (%p1451_p5), 1, %s1365_s23  }
  0x14   : > { %s1181_s11 = sshll.u32 (%p1451_p5), %s1369_s24, 4  ;;  %s1094_s12 = sshll.u32 (%p1451_p5), %s224_s10, 5 }
  0x15   : > { %s229_s15 = scalar_lea.vmem (%p1451_p5), %s1809_s4, %s1181_s11  ;;  %s226_s16 = scalar_lea.vmem (%p1451_p5), [#allocation2], %s1094_s12 }
  0x16   : > { %v263_v0 = vld [vmem:[%s229_s15] sm:$0xff] (%p1451_p5)  ;;  %v265_v1 = vld [vmem:[%s229_s15 + $0x8] sm:$0xff] (%p1451_p5) }
  0x17   : > { %v267_v2 = vld [vmem:[%s229_s15 + $0x20] sm:$0xff] (%p1451_p5)  ;;  %264 = vst [vmem:[%s226_s16] sm:$0xff] (%p1451_p5), %v263_v0  ;;  %266 = vst [vmem:[%s226_s16 + $0x8] sm:$0xff] (%p1451_p5), %v265_v1  ;;  %v269_v3 = vld [vmem:[%s229_s15 + $0x28] sm:$0xff] (%p1451_p5) }
  0x18   : > { %268 = vst [vmem:[%s226_s16 + $0x10] sm:$0xff] (%p1451_p5), %v267_v2  ;;  %270 = vst [vmem:[%s226_s16 + $0x18] sm:$0xff] (%p1451_p5), %v269_v3 }
  0x1a PF: > { %276 = sbr.rel (!%p1451_p5) target bundleno = 34 (0x22), region = 74  ;;  %s278_s17 = sand.u32 (%p1451_p5), 1, %s1365_s23  }
  0x1b   : > { %s1183_s18 = sshll.u32 (%p1451_p5), %s1369_s24, 5  ;;  %s1097_s19 = sshll.u32 (%p1451_p5), %s278_s17, 6 }
  0x1c   : > { %s284_s28 = scalar_lea.vmem (%p1451_p5), %s1810_s5, %s1183_s18  ;;  %s280_s29 = scalar_lea.vmem (%p1451_p5), [#allocation3], %s1097_s19 }
  0x1d   : > { %v297_v4 = vld [vmem:[%s284_s28] sm:$0xff] (%p1451_p5)  ;;  %v299_v5 = vld [vmem:[%s284_s28 + $0x8] sm:$0xff] (%p1451_p5)  ;;  %v301_v6 = vld [vmem:[%s284_s28 + $0x10] sm:$0xff] (%p1451_p5) }
  0x1e   : > { %298 = vst [vmem:[%s280_s29] sm:$0xff] (%p1451_p5), %v297_v4  ;;  %300 = vst [vmem:[%s280_s29 + $0x8] sm:$0xff] (%p1451_p5), %v299_v5  ;;  %v303_v7 = vld [vmem:[%s284_s28 + $0x18] sm:$0xff] (%p1451_p5)  ;;  %v305_v8 = vld [vmem:[%s284_s28 + $0x40] sm:$0xff] (%p1451_p5) }
  0x1f   : > { %302 = vst [vmem:[%s280_s29 + $0x10] sm:$0xff] (%p1451_p5), %v301_v6  ;;  %v307_v9 = vld [vmem:[%s284_s28 + $0x48] sm:$0xff] (%p1451_p5)  ;;  %304 = vst [vmem:[%s280_s29 + $0x18] sm:$0xff] (%p1451_p5), %v303_v7  ;;  %v309_v10 = vld [vmem:[%s284_s28 + $0x50] sm:$0xff] (%p1451_p5) }
  0x20   : > { %306 = vst [vmem:[%s280_s29 + $0x20] sm:$0xff] (%p1451_p5), %v305_v8  ;;  %308 = vst [vmem:[%s280_s29 + $0x28] sm:$0xff] (%p1451_p5), %v307_v9  ;;  %v311_v11 = vld [vmem:[%s284_s28 + $0x58] sm:$0xff] (%p1451_p5) }
  0x21   : > { %310 = vst [vmem:[%s280_s29 + $0x30] sm:$0xff] %v309_v10  ;;  %312 = vst [vmem:[%s280_s29 + $0x38] sm:$0xff] %v311_v11 }
  0x22 PF: > { %p1101_p10 = scmp.ge.s32.totalorder %s1369_s24, 1  ;;  %p317_p11 = scmp.lt.s32.totalorder %s1369_s24, 3 }
  0x24   : > { %p318_p12 = pnand %p1101_p10, %p317_p11 }
  0x25   : > { %v1485_v12 = vld [vmem:[%s1806_s1 + $0x4] ss:$8 sps:$4 sm:$0xff] (!%p318_p12)   ;;  %s1105_s11 = sshll.u32 (!%p318_p12), %s1433_s25, 1  ;;  %v1491_v13 = vld [vmem:[%s1806_s1] ss:$8 sps:$4 sm:$0xff] (!%p318_p12)   ;;  %v1371_v34 = vmov (!%p318_p12), 0   ;;  %v406_v57 = vlaneseq (!%p318_p12) }
  0x26   : > { %321 = sbr.rel (%p318_p12) target bundleno = 1091 (0x443), region = 97  ;;  %p371_p13 = scmp.lt.s32.totalorder (!%p318_p12), %s1105_s11, 3  ;;  %507 = vmatprep.subr.bf16.mxu0 (!%p318_p12), %v1485_v12  ;;  %564 = vmatprep.subr.bf16.mxu1 (!%p318_p12), %v1485_v12  ;;  %v1498_v14 = vld [vmem:[%s1806_s1 + $0x14] ss:$8 sps:$4 sm:$0xff] (!%p318_p12)   ;;  %v1507_v15 = vld [vmem:[%s1806_s1 + $0x10] ss:$8 sps:$4 sm:$0xff] (!%p318_p12)  }
  0x27   : > { %508 = vmatpush1.bf16.xpose.msra.mxu0 (!%p318_p12), %v1491_v13  ;;  %565 = vmatpush1.bf16.xpose.msra.mxu1 (!%p318_p12), %v1491_v13  ;;  %v1515_v16 = vld [vmem:[%s1806_s1 + $0x24] ss:$8 sps:$4 sm:$0xff] (!%p318_p12)   ;;  %v1524_v21 = vld [vmem:[%s1806_s1 + $0x20] ss:$8 sps:$4 sm:$0xff] (!%p318_p12)   ;;  %v1529_v22 = vld [vmem:[%s1806_s1 + $0x34] ss:$8 sps:$4 sm:$0xff] (!%p318_p12)  }
  0x28   : > { %509 = vmatprep.subr.bf16.mxu0 (!%p318_p12), %v1498_v14  ;;  %566 = vmatprep.subr.bf16.mxu1 (!%p318_p12), %v1498_v14  ;;  %v1538_v23 = vld [vmem:[%s1806_s1 + $0x30] ss:$8 sps:$4 sm:$0xff] (!%p318_p12)   ;;  %v1543_v24 = vld [vmem:[%s1806_s1 + $0x44] ss:$8 sps:$4 sm:$0xff] (!%p318_p12)   ;;  %v1552_v25 = vld [vmem:[%s1806_s1 + $0x40] ss:$8 sps:$4 sm:$0xff] (!%p318_p12)  }
  0x29   : > { %v1557_v26 = vld [vmem:[%s1806_s1 + $0x54] ss:$8 sps:$4 sm:$0xff] (!%p318_p12)   ;;  %v1566_v27 = vld [vmem:[%s1806_s1 + $0x50] ss:$8 sps:$4 sm:$0xff] (!%p318_p12)   ;;  %v1571_v28 = vld [vmem:[%s1806_s1 + $0x64] ss:$8 sps:$4 sm:$0xff] (!%p318_p12)  }
  0x2a   : > { %v1580_v29 = vld [vmem:[%s1806_s1 + $0x60] ss:$8 sps:$4 sm:$0xff] (!%p318_p12)   ;;  %v1585_v30 = vld [vmem:[%s1806_s1 + $0x74] ss:$8 sps:$4 sm:$0xff] (!%p318_p12)   ;;  %v1594_v31 = vld [vmem:[%s1806_s1 + $0x70] ss:$8 sps:$4 sm:$0xff] (!%p318_p12)  }
  0x2b   : > { %v1637_v35 = vld [vmem:[%s1808_s3] ss:$0 sm:$0xff] (!%p318_p12)  ;;  %s1642_s18 = sand.u32 (!%p318_p12), 1, %s1361_s22   ;;  %v1372_v56 = vmov (!%p318_p12), 1.0|1.0   ;;  %v407_v58 = vshrl.u32 (!%p318_p12), %v406_v57, 7 }
  0x2c   : > { %s1102_s19 = sshll.u32 (!%p318_p12), %s1642_s18, 5  ;;  %v404_v60 = vld [vmem:[%s1807_s2] sm:$0x3] (!%p318_p12)  ;;  %s1103_s29 = sshll.u32 (!%p318_p12), %s1642_s18, 6 }
  0x2d   : > { %s1820_s11 = smov (!%p371_p13, %s1105_s11), 3  ;;  %s1647_s20 = scalar_lea.vmem [#allocation2], %s1102_s19  ;;  %v408_v59 = vsub.s32 0, %v407_v58  ;;  %v412_v61 = vsub.s32 1, %v407_v58 }
  0x2e   : > { %s1184_s16 = sshll.u32 %s1820_s11, 3  ;;  %v418_v52 = vld [vmem:[%s1647_s20] sm:$0xff]  ;;  %v419_v53 = vld [vmem:[%s1647_s20 + $0x8] sm:$0xff]  ;;  %s1697_s7 = scalar_lea.vmem [#allocation3], %s1103_s29 }
  0x2f   : > { %s375_s26 = scalar_lea.vmem %s1805_s0, %s1184_s16  ;;  %510 = vmatpush1.bf16.xpose.msra.mxu0 %v1507_v15  ;;  %567 = vmatpush1.bf16.xpose.msra.mxu1 %v1507_v15  ;;  %v1688_v62 = vrot.slane %v404_v60, %v408_v59  ;;  %v1690_v63 = vrot.slane %v404_v60, %v412_v61  ;;  %s369_s10 = scalar_lea.vmem [#allocation4], %s1102_s19 }
  0x30   : > { %v416_v17 = vld [vmem:[%s375_s26] sm:$0xff]  ;;  %v417_v19 = vld [vmem:[%s375_s26 + $0x8] sm:$0xff]  ;;  %511 = vmatprep.subr.bf16.mxu0 %v1515_v16  ;;  %568 = vmatprep.subr.bf16.mxu1 %v1515_v16  ;;  %s993_s11 = sshll.u32 %s369_s10, 4  ;;  %s1186_s12 = sshll.u32 %s1433_s25, 9  ;;  %s1756_s11 = int_to_ptr.vmem [resolvable:$true] %s993_s11 }
  0x31   : > { %v1110_v18 = vcombine.high %v416_v17, %v416_v17  ;;  %v1130_v20 = vcombine.high %v417_v19, %v417_v19  ;;  %v1109_v32 = vcombine.low %v416_v17, %v416_v17  ;;  %v1129_v33 = vcombine.low %v417_v19, %v417_v19  ;;  %s1761_s25 = scalar_lea.hbm %s1811_s6, %s1186_s12  ;;  %s979_s15 = scalar_lea.sflag [#allocation5], %s1642_s18 }
  0x32   : > { %s1307_s16 = scalar_lea.vmem %s1756_s11, 512  ;;  %s1374_s17 = smov [#allocation4]  }
  0x33   : > { %539 = vmatprep.mubr.bf16.mxu0 %v1110_v18  ;;  %596 = vmatprep.mubr.bf16.mxu1 %v1130_v20  ;;  %p1308_p0 = scmp.ne.s32.totalorder %s1756_s11, %s1307_s16  ;;  %s1311_s19 = sshll.u32 %s1374_s17, 4  ;;  %s1312_s19 = int_to_ptr.vmem [resolvable:$false] %s1311_s19 }
  0x34   : > { %p1314_p3 = scmp.lt.s32.totalorder %s1756_s11, %s1312_s19 }
  0x35   : > { %p1309_p1 = pnand %p1308_p0, %p1455_p6 }
  0x37   : > { %512 = vmatpush1.bf16.xpose.msra.mxu0 %v1524_v21  ;;  %569 = vmatpush1.bf16.xpose.msra.mxu1 %v1524_v21  ;;  %p1310_p2 = pneg %p1309_p1 }
  0x38   : > { %513 = vmatprep.subr.bf16.mxu0 %v1529_v22  ;;  %570 = vmatprep.subr.bf16.mxu1 %v1529_v22 }
  0x3f   : > { %514 = vmatpush1.bf16.xpose.msra.mxu0 %v1538_v23  ;;  %571 = vmatpush1.bf16.xpose.msra.mxu1 %v1538_v23 }
  0x40   : > { %515 = vmatprep.subr.bf16.mxu0 %v1543_v24  ;;  %572 = vmatprep.subr.bf16.mxu1 %v1543_v24 }
  0x47   : > { %516 = vmatpush1.bf16.xpose.msra.mxu0 %v1552_v25  ;;  %573 = vmatpush1.bf16.xpose.msra.mxu1 %v1552_v25 }
  0x48   : > { %517 = vmatprep.subr.bf16.mxu0 %v1557_v26  ;;  %574 = vmatprep.subr.bf16.mxu1 %v1557_v26 }
  0x4f   : > { %518 = vmatpush1.bf16.xpose.msra.mxu0 %v1566_v27  ;;  %575 = vmatpush1.bf16.xpose.msra.mxu1 %v1566_v27 }
  0x50   : > { %519 = vmatprep.subr.bf16.mxu0 %v1571_v28  ;;  %576 = vmatprep.subr.bf16.mxu1 %v1571_v28 }
  0x57   : > { %520 = vmatpush1.bf16.xpose.msra.mxu0 %v1580_v29  ;;  %577 = vmatpush1.bf16.xpose.msra.mxu1 %v1580_v29 }
  0x58   : > { %521 = vmatprep.subr.bf16.mxu0 %v1585_v30  ;;  %578 = vmatprep.subr.bf16.mxu1 %v1585_v30 }
  0x5f   : > { %522 = vmatpush1.bf16.xpose.msra.mxu0 %v1594_v31  ;;  %579 = vmatpush1.bf16.xpose.msra.mxu1 %v1594_v31 }
  0x60   : > { %618 = vmatprep.subr.bf16.mxu0 %v1485_v12  ;;  %679 = vmatprep.subr.bf16.mxu1 %v1485_v12 }
  0x66   : > { %540 = vmatmul.mubr.bf16.vlgmr.msra.gmra.mrb[0].mxu0 %v1109_v32  ;;  %597 = vmatmul.mubr.bf16.vlgmr.msra.gmra.mrb[0].mxu1 %v1129_v33 }
  0x67   : > { %619 = vmatpush1.bf16.msra.mxu0 %v1491_v13  ;;  %680 = vmatpush1.bf16.msra.mxu1 %v1491_v13 }
  0x68   : > { %620 = vmatprep.subr.bf16.mxu0 %v1498_v14  ;;  %681 = vmatprep.subr.bf16.mxu1 %v1498_v14 }
  0x69   : > { %650 = vmatprep.mubr.bf16.mxu0 %v1371_v34  ;;  %711 = vmatprep.mubr.bf16.mxu1 %v1371_v34 }
  0x6b   : > { %621 = vmatpush1.bf16.msra.mxu0 %v1507_v15  ;;  %682 = vmatpush1.bf16.msra.mxu1 %v1507_v15 }
  0x6c   : > { %622 = vmatprep.subr.bf16.mxu0 %v1515_v16  ;;  %683 = vmatprep.subr.bf16.mxu1 %v1515_v16 }
  0x6f   : > { %623 = vmatpush1.bf16.msra.mxu0 %v1524_v21  ;;  %684 = vmatpush1.bf16.msra.mxu1 %v1524_v21 }
  0x70   : > { %624 = vmatprep.subr.bf16.mxu0 %v1529_v22  ;;  %685 = vmatprep.subr.bf16.mxu1 %v1529_v22 }
  0x73   : > { %625 = vmatpush1.bf16.msra.mxu0 %v1538_v23  ;;  %686 = vmatpush1.bf16.msra.mxu1 %v1538_v23 }
  0x74   : > { %626 = vmatprep.subr.bf16.mxu0 %v1543_v24  ;;  %687 = vmatprep.subr.bf16.mxu1 %v1543_v24 }
  0x77   : > { %627 = vmatpush1.bf16.msra.mxu0 %v1552_v25  ;;  %688 = vmatpush1.bf16.msra.mxu1 %v1552_v25 }
  0x78   : > { %628 = vmatprep.subr.bf16.mxu0 %v1557_v26  ;;  %689 = vmatprep.subr.bf16.mxu1 %v1557_v26 }
  0x7b   : > { %629 = vmatpush1.bf16.msra.mxu0 %v1566_v27  ;;  %690 = vmatpush1.bf16.msra.mxu1 %v1566_v27 }
  0x7c   : > { %630 = vmatprep.subr.bf16.mxu0 %v1571_v28  ;;  %691 = vmatprep.subr.bf16.mxu1 %v1571_v28 }
  0x7f   : > { %631 = vmatpush1.bf16.msra.mxu0 %v1580_v29  ;;  %692 = vmatpush1.bf16.msra.mxu1 %v1580_v29 }
  0x80   : > { %632 = vmatprep.subr.bf16.mxu0 %v1585_v30  ;;  %693 = vmatprep.subr.bf16.mxu1 %v1585_v30 }
  0x83   : > { %633 = vmatpush1.bf16.msra.mxu0 %v1594_v31  ;;  %694 = vmatpush1.bf16.msra.mxu1 %v1594_v31 }
  0x84   : > { %743 = vmatprep.subr.bf16.mxu0 %v1485_v12  ;;  %793 = vmatprep.subr.bf16.mxu1 %v1485_v12 }
 0x139   : > { %v541_v36 = vpop.f32.mrb[0].mxu0  ;;  %v598_v37 = vpop.f32.mrb[0].mxu1 }
 0x13a   : > { %v542_v38 = vadd.f32 %v1637_v35, %v541_v36  ;;  %v599_v39 = vadd.f32 %v1637_v35, %v598_v37  ;;  %v543_v40 = vpop.f32.mrb[1].mxu0  ;;  %v600_v41 = vpop.f32.mrb[1].mxu1 }
 0x13b   : > { %v544_v42 = vpop.f32.mrb[2].mxu0  ;;  %v601_v43 = vpop.f32.mrb[2].mxu1  ;;  %v614_v41 = vld [vmem:[%s1697_s7] sm:$0xff] }
 0x13c   : > { %v1127_v44 = vmul.f32 -1.442695, %v542_v38  ;;  %v1131_v45 = vmul.f32 -1.442695, %v599_v39  ;;  %v545_v46 = vpop.f32.mrb[3].mxu0  ;;  %v602_v47 = vpop.f32.mrb[3].mxu1 }
 0x13d   : > { %v615_v43 = vld [vmem:[%s1697_s7 + $0x8] sm:$0xff]  ;;  %v617_v46 = vld [vmem:[%s1697_s7 + $0x18] sm:$0xff] }
 0x13e   : > { %1259 = vpow2.f32 %v1127_v44  ;;  %v616_v44 = vld [vmem:[%s1697_s7 + $0x10] sm:$0xff] }
 0x13f   : > { %1261 = vpow2.f32 %v1131_v45 }
 0x148   : > { %v1260_v48 = vpop.eup %1259 }
 0x149   : > { %v1262_v49 = vpop.eup %1261  ;;  %v550_v50 = vadd.f32 1.0, %v1260_v48 }
 0x14a   : > { %v607_v51 = vadd.f32 1.0, %v1262_v49  ;;  %v1145_v49 = vld [vmem:[%s1647_s20 + $0x10] sm:$0xff] }
 0x14b   : > { %1263 = vrcp.f32 %v550_v50  ;;  %v1146_v50 = vld [vmem:[%s1647_s20 + $0x18] sm:$0xff]  ;;  %s1313_s20 = scalar_lea.vmem %s1312_s19, 1024 }
 0x14c   : > { %1265 = vrcp.f32 %v607_v51  ;;  %p1315_p4 = scmp.lt.s32.totalorder %s1313_s20, %s1307_s16 }
 0x14e   : > { %p1316_p5 = por %p1315_p4, %p1314_p3 }
 0x150   : > { %p1317_p7 = pnand %p1316_p5, %p1310_p2 }
 0x155   : > { %v1264_v54 = vpop.eup %1263 }
 0x156   : > { %v1266_v55 = vpop.eup %1265  ;;  %vm553_vm0 = vcmp.gt.f32.partialorder %v1264_v54, %v418_v52 }
 0x157   : > { %vm1133_vm1 = vmpackc.low %vm553_vm0, %vm553_vm0  ;;  %vm610_vm2 = vcmp.gt.f32.partialorder %v1266_v55, %v419_v53 }
 0x158   : > { %1134 = vmatmul.mubr.msk.bf16.vlgmr.msra.gmra.mrb[4].mxu0 %vm1133_vm1, %v1372_v56  ;;  %vm1139_vm3 = vmpackc.low %vm610_vm2, %vm610_vm2 }
 0x159   : > { %1140 = vmatmul.mubr.msk.bf16.vlgmr.msra.gmra.mrb[4].mxu1 %vm1139_vm3, %v1372_v56  ;;  %744 = vmatpush1.bf16.xpose.msra.mxu0 %v1491_v13 }
 0x15a   : > { %794 = vmatpush1.bf16.xpose.msra.mxu1 %v1491_v13  ;;  %745 = vmatprep.subr.bf16.mxu0 %v1498_v14 }
 0x15b   : > { %795 = vmatprep.subr.bf16.mxu1 %v1498_v14 }
 0x161   : > { %746 = vmatpush1.bf16.xpose.msra.mxu0 %v1507_v15 }
 0x162   : > { %796 = vmatpush1.bf16.xpose.msra.mxu1 %v1507_v15  ;;  %747 = vmatprep.subr.bf16.mxu0 %v1515_v16 }
 0x163   : > { %797 = vmatprep.subr.bf16.mxu1 %v1515_v16 }
 0x169   : > { %748 = vmatpush1.bf16.xpose.msra.mxu0 %v1524_v21 }
 0x16a   : > { %798 = vmatpush1.bf16.xpose.msra.mxu1 %v1524_v21  ;;  %749 = vmatprep.subr.bf16.mxu0 %v1529_v22 }
 0x16b   : > { %799 = vmatprep.subr.bf16.mxu1 %v1529_v22 }
 0x171   : > { %750 = vmatpush1.bf16.xpose.msra.mxu0 %v1538_v23 }
 0x172   : > { %800 = vmatpush1.bf16.xpose.msra.mxu1 %v1538_v23  ;;  %751 = vmatprep.subr.bf16.mxu0 %v1543_v24 }
 0x173   : > { %801 = vmatprep.subr.bf16.mxu1 %v1543_v24 }
 0x179   : > { %752 = vmatpush1.bf16.xpose.msra.mxu0 %v1552_v25 }
 0x17a   : > { %802 = vmatpush1.bf16.xpose.msra.mxu1 %v1552_v25  ;;  %753 = vmatprep.subr.bf16.mxu0 %v1557_v26 }
 0x17b   : > { %803 = vmatprep.subr.bf16.mxu1 %v1557_v26 }
 0x181   : > { %754 = vmatpush1.bf16.xpose.msra.mxu0 %v1566_v27 }
 0x182   : > { %804 = vmatpush1.bf16.xpose.msra.mxu1 %v1566_v27  ;;  %755 = vmatprep.subr.bf16.mxu0 %v1571_v28 }
 0x183   : > { %805 = vmatprep.subr.bf16.mxu1 %v1571_v28 }
 0x189   : > { %756 = vmatpush1.bf16.xpose.msra.mxu0 %v1580_v29 }
 0x18a   : > { %806 = vmatpush1.bf16.xpose.msra.mxu1 %v1580_v29  ;;  %757 = vmatprep.subr.bf16.mxu0 %v1585_v30 }
 0x18b   : > { %807 = vmatprep.subr.bf16.mxu1 %v1585_v30 }
 0x191   : > { %758 = vmatpush1.bf16.xpose.msra.mxu0 %v1594_v31 }
 0x192   : > { %808 = vmatpush1.bf16.xpose.msra.mxu1 %v1594_v31  ;;  %848 = vmatprep.subr.bf16.mxu0 %v1485_v12 }
 0x193   : > { %913 = vmatprep.subr.bf16.mxu1 %v1485_v12 }
 0x22b   : > { %v652_v0 = vpop.f32.mrb[4].mxu0 }
 0x22c   : > { %v653_v1 = vadd.f32 %v652_v0, %v1688_v62  ;;  %v713_v2 = vpop.f32.mrb[4].mxu1  ;;  %v654_v3 = vpop.f32.mrb[5].mxu0 }
 0x22d   : > { %v714_v4 = vadd.f32 %v713_v2, %v1688_v62  ;;  %v655_v5 = vadd.f32 %v654_v3, %v1690_v63  ;;  %v715_v6 = vpop.f32.mrb[5].mxu1  ;;  %v656_v7 = vpop.f32.mrb[6].mxu0 }
 0x22e   : > { %v1135_v8 = vmul.f32 -1.442695, %v653_v1  ;;  %v716_v9 = vadd.f32 %v715_v6, %v1690_v63  ;;  %v717_v10 = vpop.f32.mrb[6].mxu1  ;;  %v657_v11 = vpop.f32.mrb[7].mxu0 }
 0x22f   : > { %v1141_v12 = vmul.f32 -1.442695, %v714_v4  ;;  %v1136_v17 = vmul.f32 -1.442695, %v655_v5  ;;  %v718_v18 = vpop.f32.mrb[7].mxu1 }
 0x230   : > { %1267 = vpow2.f32 %v1135_v8  ;;  %v1142_v19 = vmul.f32 -1.442695, %v716_v9 }
 0x231   : > { %1269 = vpow2.f32 %v1141_v12  ;;  %v1159_v12 = vld [vmem:[%s1697_s7 + $0x20] sm:$0xff] }
 0x232   : > { %1271 = vpow2.f32 %v1136_v17  ;;  %v1161_v17 = vld [vmem:[%s1697_s7 + $0x30] sm:$0xff] }
 0x233   : > { %1273 = vpow2.f32 %v1142_v19  ;;  %v1160_v19 = vld [vmem:[%s1697_s7 + $0x28] sm:$0xff] }
 0x23a   : > { %v1268_v20 = vpop.eup %1267 }
 0x23b   : > { %v1270_v32 = vpop.eup %1269  ;;  %v665_v33 = vadd.f32 1.0, %v1268_v20 }
 0x23c   : > { %v1272_v36 = vpop.eup %1271  ;;  %v726_v37 = vadd.f32 1.0, %v1270_v32  ;;  %v1162_v32 = vld [vmem:[%s1697_s7 + $0x38] sm:$0xff] }
 0x23d   : > { %v1274_v38 = vpop.eup %1273  ;;  %1275 = vrcp.f32 %v665_v33  ;;  %v666_v39 = vadd.f32 1.0, %v1272_v36  ;;  %v1373_v36 = vmov 0.0  }
 0x23e   : > { %1277 = vrcp.f32 %v726_v37  ;;  %v727_v40 = vadd.f32 1.0, %v1274_v38 }
 0x23f   : > { %1279 = vrcp.f32 %v666_v39 }
 0x240   : > { %1281 = vrcp.f32 %v727_v40 }
 0x247   : > { %v1276_v42 = vpop.eup %1275 }
 0x248   : > { %v1278_v45 = vpop.eup %1277  ;;  %vm671_vm4 = vcmp.gt.f32.partialorder %v1276_v42, %v614_v41 }
 0x249   : > { %v1280_v47 = vpop.eup %1279  ;;  %vm1149_vm6 = vmpackc.low %vm671_vm4, %vm671_vm4  ;;  %vm732_vm7 = vcmp.gt.f32.partialorder %v1278_v45, %v616_v44 }
 0x24a   : > { %v1282_v48 = vpop.eup %1281  ;;  %vm672_vm5 = vcmp.gt.f32.partialorder %v1280_v47, %v615_v43  ;;  %vm1155_vm11 = vmpackc.low %vm732_vm7, %vm732_vm7 }
 0x24b   : > { %vm1147_vm8 = vmpackc.low %vm672_vm5, %vm672_vm5  ;;  %vm733_vm9 = vcmp.gt.f32.partialorder %v1282_v48, %v617_v46 }
 0x24c   : > { %1148 = vmatprep.mubr.msk.bf16.mxu0 %vm1147_vm8, %v1372_v56  ;;  %vm1153_vm10 = vmpackc.low %vm733_vm9, %vm733_vm9 }
 0x24d   : > { %1154 = vmatprep.mubr.msk.bf16.mxu1 %vm1153_vm10, %v1372_v56  ;;  %1150 = vmatmul.mubr.msk.bf16.vlgmr.msra.gmra.mrb[8].mxu0 %vm1149_vm6, %v1372_v56 }
 0x24e   : > { %1156 = vmatmul.mubr.msk.bf16.vlgmr.msra.gmra.mrb[8].mxu1 %vm1155_vm11, %v1372_v56  ;;  %849 = vmatpush1.bf16.msra.mxu0 %v1491_v13 }
 0x24f   : > { %914 = vmatpush1.bf16.msra.mxu1 %v1491_v13  ;;  %850 = vmatprep.subr.bf16.mxu0 %v1498_v14 }
 0x250   : > { %915 = vmatprep.subr.bf16.mxu1 %v1498_v14  ;;  %880 = vmatprep.mubr.bf16.mxu0 %v1371_v34 }
 0x251   : > { %945 = vmatprep.mubr.bf16.mxu1 %v1371_v34 }
 0x252   : > { %851 = vmatpush1.bf16.msra.mxu0 %v1507_v15 }
 0x253   : > { %916 = vmatpush1.bf16.msra.mxu1 %v1507_v15  ;;  %852 = vmatprep.subr.bf16.mxu0 %v1515_v16 }
 0x254   : > { %917 = vmatprep.subr.bf16.mxu1 %v1515_v16 }
 0x256   : > { %853 = vmatpush1.bf16.msra.mxu0 %v1524_v21 }
 0x257   : > { %918 = vmatpush1.bf16.msra.mxu1 %v1524_v21  ;;  %854 = vmatprep.subr.bf16.mxu0 %v1529_v22 }
 0x258   : > { %919 = vmatprep.subr.bf16.mxu1 %v1529_v22 }
 0x25a   : > { %855 = vmatpush1.bf16.msra.mxu0 %v1538_v23 }
 0x25b   : > { %920 = vmatpush1.bf16.msra.mxu1 %v1538_v23  ;;  %856 = vmatprep.subr.bf16.mxu0 %v1543_v24 }
 0x25c   : > { %921 = vmatprep.subr.bf16.mxu1 %v1543_v24 }
 0x25e   : > { %857 = vmatpush1.bf16.msra.mxu0 %v1552_v25 }
 0x25f   : > { %922 = vmatpush1.bf16.msra.mxu1 %v1552_v25  ;;  %858 = vmatprep.subr.bf16.mxu0 %v1557_v26 }
 0x260   : > { %923 = vmatprep.subr.bf16.mxu1 %v1557_v26 }
 0x262   : > { %859 = vmatpush1.bf16.msra.mxu0 %v1566_v27 }
 0x263   : > { %924 = vmatpush1.bf16.msra.mxu1 %v1566_v27  ;;  %860 = vmatprep.subr.bf16.mxu0 %v1571_v28 }
 0x264   : > { %925 = vmatprep.subr.bf16.mxu1 %v1571_v28 }
 0x266   : > { %861 = vmatpush1.bf16.msra.mxu0 %v1580_v29 }
 0x267   : > { %926 = vmatpush1.bf16.msra.mxu1 %v1580_v29  ;;  %862 = vmatprep.subr.bf16.mxu0 %v1585_v30 }
 0x268   : > { %927 = vmatprep.subr.bf16.mxu1 %v1585_v30 }
 0x26a   : > { %863 = vmatpush1.bf16.msra.mxu0 %v1594_v31 }
 0x26b   : > { %928 = vmatpush1.bf16.msra.mxu1 %v1594_v31 }
 0x320   : > { %v777_v13 = vpop.f32.mrb[8].mxu0 }
 0x321   : > { %v778_v14 = vadd.f32 %v1637_v35, %v777_v13  ;;  %v827_v15 = vpop.f32.mrb[8].mxu1  ;;  %v779_v16 = vpop.f32.mrb[9].mxu0 }
 0x322   : > { %v828_v21 = vadd.f32 %v1637_v35, %v827_v15  ;;  %v829_v22 = vpop.f32.mrb[9].mxu1  ;;  %v780_v23 = vpop.f32.mrb[10].mxu0 }
 0x323   : > { %v1151_v24 = vmul.f32 -1.442695, %v778_v14  ;;  %v830_v25 = vpop.f32.mrb[10].mxu1  ;;  %v781_v26 = vpop.f32.mrb[11].mxu0 }
 0x324   : > { %v1157_v27 = vmul.f32 -1.442695, %v828_v21  ;;  %v831_v28 = vpop.f32.mrb[11].mxu1 }
 0x325   : > { %1283 = vpow2.f32 %v1151_v24 }
 0x326   : > { %1285 = vpow2.f32 %v1157_v27 }
 0x32f   : > { %v1284_v29 = vpop.eup %1283 }
 0x330   : > { %v1286_v30 = vpop.eup %1285  ;;  %v786_v31 = vadd.f32 1.0, %v1284_v29 }
 0x331   : > { %v836_v34 = vadd.f32 1.0, %v1286_v30 }
 0x332   : > { %1287 = vrcp.f32 %v786_v31 }
 0x333   : > { %1289 = vrcp.f32 %v836_v34 }
 0x33c   : > { %v1288_v35 = vpop.eup %1287 }
 0x33d   : > { %v1290_v51 = vpop.eup %1289  ;;  %vm789_vm12 = vcmp.gt.f32.partialorder %v1288_v35, %v1145_v49 }
 0x33e   : > { %vm1163_vm13 = vmpackc.low %vm789_vm12, %vm789_vm12  ;;  %vm839_vm14 = vcmp.gt.f32.partialorder %v1290_v51, %v1146_v50 }
 0x33f   : > { %1164 = vmatmul.mubr.msk.bf16.vlgmr.msra.gmra.mrb[12].mxu0 %vm1163_vm13, %v1372_v56  ;;  %vm1169_vm15 = vmpackc.low %vm839_vm14, %vm839_vm14 }
 0x340   : > { %1170 = vmatmul.mubr.msk.bf16.vlgmr.msra.gmra.mrb[12].mxu1 %vm1169_vm15, %v1372_v56 }
 0x412   : > { %v882_v52 = vpop.f32.mrb[12].mxu0 }
 0x413   : > { %v883_v53 = vadd.f32 %v882_v52, %v1688_v62  ;;  %v947_v54 = vpop.f32.mrb[12].mxu1  ;;  %v884_v55 = vpop.f32.mrb[13].mxu0 }
 0x414   : > { %v948_v57 = vadd.f32 %v947_v54, %v1688_v62  ;;  %v885_v58 = vadd.f32 %v884_v55, %v1690_v63  ;;  %v949_v59 = vpop.f32.mrb[13].mxu1  ;;  %v886_v60 = vpop.f32.mrb[14].mxu0 }
 0x415   : > { %v1165_v61 = vmul.f32 -1.442695, %v883_v53  ;;  %v950_v0 = vadd.f32 %v949_v59, %v1690_v63  ;;  %v951_v1 = vpop.f32.mrb[14].mxu1  ;;  %v887_v2 = vpop.f32.mrb[15].mxu0 }
 0x416   : > { %v1171_v3 = vmul.f32 -1.442695, %v948_v57  ;;  %v1166_v4 = vmul.f32 -1.442695, %v885_v58  ;;  %v952_v5 = vpop.f32.mrb[15].mxu1 }
 0x417   : > { %1291 = vpow2.f32 %v1165_v61  ;;  %v1172_v56 = vmul.f32 -1.442695, %v950_v0 }
 0x418   : > { %1293 = vpow2.f32 %v1171_v3 }
 0x419   : > { %1295 = vpow2.f32 %v1166_v4 }
 0x41a   : > { %1297 = vpow2.f32 %v1172_v56 }
 0x421   : > { %v1292_v62 = vpop.eup %1291 }
 0x422   : > { %v1294_v6 = vpop.eup %1293  ;;  %v895_v7 = vadd.f32 1.0, %v1292_v62 }
 0x423   : > { %v1296_v8 = vpop.eup %1295  ;;  %v960_v63 = vadd.f32 1.0, %v1294_v6 }
 0x424   : > { %v1298_v9 = vpop.eup %1297  ;;  %1299 = vrcp.f32 %v895_v7  ;;  %v896_v10 = vadd.f32 1.0, %v1296_v8 }
 0x425   : > { %1301 = vrcp.f32 %v960_v63  ;;  %v961_v11 = vadd.f32 1.0, %v1298_v9 }
 0x426   : > { %1303 = vrcp.f32 %v896_v10 }
 0x427   : > { %1305 = vrcp.f32 %v961_v11 }
 0x42e   : > { %v1300_v18 = vpop.eup %1299 }
 0x42f   : > { %v1302_v20 = vpop.eup %1301  ;;  %vm901_vm0 = vcmp.gt.f32.partialorder %v1300_v18, %v1159_v12 }
 0x430   : > { %v1304_v33 = vpop.eup %1303  ;;  %v1167_v37 = vsel %vm901_vm0, 1.0, %v1373_v36  ;;  %vm966_vm1 = vcmp.gt.f32.partialorder %v1302_v20, %v1161_v17 }
 0x431   : > { %v1306_v38 = vpop.eup %1305  ;;  %911 = vst [vmem:[%s369_s10] sm:$0xff] %v1167_v37  ;;  %v1173_v39 = vsel %vm966_vm1, 1.0, %v1373_v36  ;;  %vm902_vm2 = vcmp.gt.f32.partialorder %v1304_v33, %v1160_v19 }
 0x432   : > { %976 = vst [vmem:[%s369_s10 + $0x10] sm:$0xff] %v1173_v39  ;;  %v1168_v40 = vsel %vm902_vm2, 1.0, %v1373_v36  ;;  %vm967_vm3 = vcmp.gt.f32.partialorder %v1306_v38, %v1162_v32 }
 0x433   : > { %912 = vst [vmem:[%s369_s10 + $0x8] sm:$0xff] %v1168_v40  ;;  %v1174_v41 = vsel %vm967_vm3, 1.0, %v1373_v36 }
 0x434   : > { %977 = vst [vmem:[%s369_s10 + $0x18] sm:$0xff] %v1174_v41 }
 0x435   : > { %1320 = shalt.err (!%p1317_p7)
}
 0x436   : > { %s1321_s26 = scalar_lea.hbm %s1761_s25, 512  ;;  %s1325_s7 = scalar_lea.hbm %s1811_s6, 1024 }
 0x437   : > { %p1322_p10 = scmp.ne.s32.totalorder %s1761_s25, %s1321_s26  ;;  %p1326_p13 = scmp.lt.u32.totalorder %s1761_s25, %s1811_s6 }
 0x438   : > { %p1327_p0 = scmp.lt.u32.totalorder %s1325_s7, %s1321_s26  ;;  %p1329_p2 = scmp.lt.u32.totalorder %s1321_s26, %s1761_s25 }
 0x439   : > { %p1323_p11 = pnand %p1322_p10, %p1455_p6 }
 0x43a   : > { %p1328_p1 = por %p1327_p0, %p1326_p13 }
 0x43b   : > { %p1324_p12 = pneg %p1323_p11 }
 0x43c   : > { %p1330_p3 = por %p1329_p2, %p1328_p1 }
 0x43e   : > { %p1331_p4 = pnand %p1330_p3, %p1324_p12 }
 0x440   : > { %1334 = shalt.err (!%p1331_p4)
}
 0x441   : > { %s1375_s13 = smov 256   ;;  %s1376_s14 = smov 16  }
 0x442   : > { %1187 = dma.vmem_to_hbm [thread:$0]  (%p1455_p6), %s1756_s11, 512, %s1761_s25, %s979_s15, %s1375_s13, %s1375_s13, %s1376_s14  }
 0x443 PF: > { %s1008_s16 = sand.u32 1, %s1357_s21   ;;  %p1190_p5 = pnand %p1093_p9, %p1459_p8 }
 0x444   : > { %s1009_s17 = scalar_lea.sflag [#allocation5], %s1008_s16 }
 0x445   : > { %1352 = dma.done.wait (!%p1190_p5), %s1009_s17, 512  }
 0x446   : > { %1354 = vsyncadd (!%p1190_p5), %s1009_s17, 4294966784  ;;  %p16_p7 = scmp.ge.s32.totalorder %s1437_s27, 4   ;;  %s1815_s21 = smov %s1361_s22 }
 0x447   : > { %s1816_s22 = smov %s1365_s23  ;;  %s1817_s23 = smov %s1449_s30 }
 0x448   : > { %s1818_s24 = smov %s1437_s27  ;;  %18 = sbr.rel (!%p16_p7) target bundleno = 3 (0x3), region = 158 }
 0x44f   :  { %1014 = vsyncpa [#allocation5], 1 }
 0x450   :  { %1016 = vsyncpa [#allocation5 + $0x1], 1 }

</bundles_post_ra>
